<compile_context>
chip_gen: v7x
topology: tpu7x:2x2x1
jax: 0.10.0
libtpu: 0.0.40
codegen_flags: <defaults>
</compile_context>

<pallas_src>
import functools

import jax
import jax.numpy as jnp
from jax.experimental import pallas as pl
from jax.experimental.pallas import tpu as pltpu

_HIDDEN = 64  # per-head hidden width (fixed by the PyTorch module)


def _sigmoid(z):
    # exp + approx reciprocal: both land on the EUP slot (free vs. the VPU divide).
    return pl.reciprocal(1.0 + jnp.exp(-z), approx=True)


def _fused_heads_kernel(x_ref, w1_ref, b1_ref,
                        w2c_ref, b2c_ref, w2g_ref, b2g_ref, w2s_ref, b2s_ref,
                        oc_ref, og_ref, os_ref, h_ref):
    """Grid = (batch tiles, sku-column tiles).

    j == 0: layer 1 for all heads (one MXU pass), cache relu(h) in VMEM scratch,
            and finish the two small heads (churn, category).
    every j: one output-column tile of the sku head.
    """
    H = _HIDDEN
    j = pl.program_id(1)

    @pl.when(j == 0)
    def _():
        x = x_ref[...].astype(jnp.bfloat16)                                  # (tb, E)
        h = jnp.dot(x, w1_ref[...], preferred_element_type=jnp.float32)      # (tb, 3H)
        h = jnp.maximum(h + b1_ref[...], 0.0).astype(jnp.bfloat16)
        h_ref[...] = h                                                        # cache for j > 0

        # Churn head (dense (H, 128) W2, padded columns -> lane-dense store).
        zc = jnp.dot(h[:, 0:H], w2c_ref[...], preferred_element_type=jnp.float32)
        oc_ref[...] = _sigmoid(zc + b2c_ref[...]).astype(oc_ref.dtype)

        # Category head.
        zg = jnp.dot(h[:, H:2 * H], w2g_ref[...], preferred_element_type=jnp.float32)
        og_ref[...] = _sigmoid(zg + b2g_ref[...]).astype(og_ref.dtype)

    # Sku head: one column tile per grid step, hidden slice re-read from scratch.
    hs = h_ref[:, 2 * H:3 * H]                                                # (tb, H) bf16
    zs = jnp.dot(hs, w2s_ref[...], preferred_element_type=jnp.float32)        # (tb, tn)
    os_ref[...] = _sigmoid(zs + b2s_ref[...]).astype(os_ref.dtype)


def fused_multitask_heads(x, w1_all, b1_all,
                          w2_churn, b2_churn, w2_cat, b2_cat, w2_sku, b2_sku,
                          *, block_rows=256, block_cols=2048,
                          out_dtype=jnp.float32):
    """Single pallas_call running all three heads (batch x sku-column grid)."""
    B, E = x.shape
    H3 = w1_all.shape[1]          # 3 * 64
    H = H3 // 3
    Pc = w2_churn.shape[1]        # 128          (churn, padded)
    Pg = w2_cat.shape[1]          # cat padded to multiple of 128
    Ps = w2_sku.shape[1]          # sku padded to multiple of 128

    tb = min(block_rows, B)
    tn = min(block_cols, Ps)
    grid = (pl.cdiv(B, tb), pl.cdiv(Ps, tn))

    cost = pl.CostEstimate(
        flops=2 * B * (E * H3 + H * (Pc + Pg + Ps)),
        transcendentals=B * (Pc + Pg + Ps),
        bytes_accessed=(x.size * x.dtype.itemsize
                        + w1_all.size * w1_all.dtype.itemsize
                        + b1_all.size * b1_all.dtype.itemsize
                        + w2_churn.size * w2_churn.dtype.itemsize
                        + w2_cat.size * w2_cat.dtype.itemsize
                        + w2_sku.size * w2_sku.dtype.itemsize
                        + B * (Pc + Pg + Ps) * jnp.dtype(out_dtype).itemsize),
    )

    out_shape = (
        jax.ShapeDtypeStruct((B, Pc), out_dtype),
        jax.ShapeDtypeStruct((B, Pg), out_dtype),
        jax.ShapeDtypeStruct((B, Ps), out_dtype),
    )

    return pl.pallas_call(
        _fused_heads_kernel,
        out_shape=out_shape,
        grid=grid,
        in_specs=[
            pl.BlockSpec((tb, E), lambda i, j: (i, 0)),     # x: tiled over batch, resident over j
            pl.BlockSpec((E, H3), lambda i, j: (0, 0)),     # W1_all (resident)
            pl.BlockSpec((1, H3), lambda i, j: (0, 0)),     # b1_all (resident)
            pl.BlockSpec((H, Pc), lambda i, j: (0, 0)),     # W2 churn (dense, padded)
            pl.BlockSpec((1, Pc), lambda i, j: (0, 0)),     # b2 churn
            pl.BlockSpec((H, Pg), lambda i, j: (0, 0)),     # W2 category
            pl.BlockSpec((1, Pg), lambda i, j: (0, 0)),     # b2 category
            pl.BlockSpec((H, tn), lambda i, j: (0, j)),     # W2 sku: column-tiled
            pl.BlockSpec((1, tn), lambda i, j: (0, j)),     # b2 sku: column-tiled
        ],
        out_specs=(
            pl.BlockSpec((tb, Pc), lambda i, j: (i, 0)),    # churn (written at j==0)
            pl.BlockSpec((tb, Pg), lambda i, j: (i, 0)),    # category (written at j==0)
            pl.BlockSpec((tb, tn), lambda i, j: (i, j)),    # sku (per column tile)
        ),
        scratch_shapes=[pltpu.VMEM((tb, H3), jnp.bfloat16)],  # cached relu(x@W1+b1)
        compiler_params=pltpu.CompilerParams(
            dimension_semantics=("parallel", "arbitrary"),    # batch sharded; column axis carries scratch
        ),
        cost_estimate=cost,
    )(x, w1_all, b1_all, w2_churn, b2_churn, w2_cat, b2_cat, w2_sku, b2_sku)


def _round_up(n, m):
    return ((n + m - 1) // m) * m


def _init_linear(key, fan_in, fan_out):
    """Deterministic init mimicking PyTorch nn.Linear default (U[-1/sqrt(fan_in), +])."""
    kw, kb = jax.random.split(key)
    bound = 1.0 / jnp.sqrt(jnp.float32(fan_in))
    w = jax.random.uniform(kw, (fan_in, fan_out), jnp.float32, -bound, bound)
    b = jax.random.uniform(kb, (1, fan_out), jnp.float32, -bound, bound)
    return w, b


class MultiTaskHeadsPallas:
    """JAX/Pallas port of MultiTaskHeads (fused single-kernel forward)."""

    HIDDEN = _HIDDEN

    def __init__(self, embedding_dim: int, num_categories: int, num_skus: int, key,
                 block_rows: int = 256, block_cols: int = 2048,
                 out_dtype=jnp.float32):
        self.out_dims = (1, num_categories, num_skus)
        self.block_rows = block_rows
        self.block_cols = block_cols
        self.out_dtype = out_dtype
        keys = jax.random.split(key, 6)

        names = ("churn", "category", "sku")

        # Per-head f32 params (pure-JAX reference / PyTorch-equivalent semantics).
        self.head_params = {}
        for idx, (name, out_dim) in enumerate(zip(names, self.out_dims)):
            w1, b1 = _init_linear(keys[2 * idx], embedding_dim, self.HIDDEN)
            w2, b2 = _init_linear(keys[2 * idx + 1], self.HIDDEN, out_dim)
            self.head_params[name] = (w1, b1, w2, b2)

        # ---- Fused kernel params ----
        # Layer 1: concatenated so it is one MXU pass.  Layer 2: densely packed
        # per-head W2, with output columns padded up to a multiple of 128 so the
        # stores stay lane-dense (padding is sliced off in __call__).
        self.pad_dims = tuple(_round_up(d, 128) for d in self.out_dims)

        w1_all = jnp.concatenate([self.head_params[n][0] for n in names], axis=1)  # (E, 3H)
        b1_all = jnp.concatenate([self.head_params[n][1] for n in names], axis=1)  # (1, 3H)

        def pad_cols(a, p):
            return jnp.pad(a, ((0, 0), (0, p - a.shape[1])))

        w2_pad, b2_pad = [], []
        for name, p in zip(names, self.pad_dims):
            _, _, w2, b2 = self.head_params[name]
            w2_pad.append(pad_cols(w2, p))
            b2_pad.append(pad_cols(b2, p))

        # bf16 weights halve HBM->VMEM traffic and use the native bf16 MXU path;
        # biases stay f32 (added after the f32 accumulate).
        self.w1_all = w1_all.astype(jnp.bfloat16)
        self.b1_all = b1_all
        self.w2_churn = w2_pad[0].astype(jnp.bfloat16)
        self.b2_churn = b2_pad[0]
        self.w2_cat = w2_pad[1].astype(jnp.bfloat16)
        self.b2_cat = b2_pad[1]
        self.w2_sku = w2_pad[2].astype(jnp.bfloat16)
        self.b2_sku = b2_pad[2]

    @functools.partial(jax.jit, static_argnums=0)
    def __call__(self, user_emb):
        churn_p, cat_p, sku_p = fused_multitask_heads(
            user_emb, self.w1_all, self.b1_all,
            self.w2_churn, self.b2_churn,
            self.w2_cat, self.b2_cat,
            self.w2_sku, self.b2_sku,
            block_rows=self.block_rows, block_cols=self.block_cols,
            out_dtype=self.out_dtype)
        # Strip the 128-alignment padding with static (lane-aligned start) slices.
        churn = churn_p[:, :self.out_dims[0]]
        category = cat_p[:, :self.out_dims[1]]
        sku = sku_p[:, :self.out_dims[2]]
        return churn, category, sku


def _ref_forward(model, x):
    """Pure-JAX reference (per-head f32 params, matches the PyTorch module)."""
    outs = []
    for name in ("churn", "category", "sku"):
        w1, b1, w2, b2 = model.head_params[name]
        h = jnp.maximum(x @ w1 + b1, 0.0)
        outs.append(jax.nn.sigmoid(h @ w2 + b2))
    return tuple(outs)


if __name__ == "__main__":
    batch = 8
    embedding_dim = 32
    num_categories = 8
    num_skus = 16

    root = jax.random.PRNGKey(0)
    k_param, k_x = jax.random.split(root)

    model = MultiTaskHeadsPallas(embedding_dim, num_categories, num_skus, k_param)
    user_emb = jax.random.normal(k_x, (batch, embedding_dim), jnp.float32)

    churn, category, sku = model(user_emb)
    jax.block_until_ready((churn, category, sku))

    # Sanity check against the pure-JAX f32 reference (bf16 MXU + approx reciprocal
    # => looser tolerance).
    r_churn, r_cat, r_sku = _ref_forward(model, user_emb)
    assert churn.shape == (batch, 1)
    assert category.shape == (batch, num_categories)
    assert sku.shape == (batch, num_skus)
    assert jnp.allclose(churn, r_churn, atol=2e-2)
    assert jnp.allclose(category, r_cat, atol=2e-2)
    assert jnp.allclose(sku, r_sku, atol=2e-2)

    print("KERNEL_OK")
</pallas_src>

<mosaic_0001>
module attributes {stable_mosaic.version = 11 : i64} {
  func.func @_fused_heads_kernel(%arg0: i32, %arg1: i32, %arg2: memref<8x32xf32, #tpu.memory_space<vmem>>, %arg3: memref<32x192xbf16, #tpu.memory_space<vmem>>, %arg4: memref<1x192xf32, #tpu.memory_space<vmem>>, %arg5: memref<64x128xbf16, #tpu.memory_space<vmem>>, %arg6: memref<1x128xf32, #tpu.memory_space<vmem>>, %arg7: memref<64x128xbf16, #tpu.memory_space<vmem>>, %arg8: memref<1x128xf32, #tpu.memory_space<vmem>>, %arg9: memref<64x128xbf16, #tpu.memory_space<vmem>>, %arg10: memref<1x128xf32, #tpu.memory_space<vmem>>, %arg11: memref<8x128xf32, #tpu.memory_space<vmem>>, %arg12: memref<8x128xf32, #tpu.memory_space<vmem>>, %arg13: memref<8x128xf32, #tpu.memory_space<vmem>>, %arg14: memref<8x192xbf16, #tpu.memory_space<vmem>>) attributes {dimension_semantics = [#tpu.dimension_semantics<parallel>, #tpu.dimension_semantics<arbitrary>], iteration_bounds = array<i64: 1, 1>, scalar_prefetch = 0 : i64, scratch_operands = 1 : i64, tpu.core_type = #tpu.core_type<tc>, window_params = [{transform_indices = @transform_0, window_bounds = array<i64: 8, 32>}, {pipeline_mode = #tpu.pipeline_mode<synchronous>, transform_indices = @transform_1, window_bounds = array<i64: 32, 192>}, {pipeline_mode = #tpu.pipeline_mode<synchronous>, transform_indices = @transform_2, window_bounds = array<i64: 1, 192>}, {pipeline_mode = #tpu.pipeline_mode<synchronous>, transform_indices = @transform_3, window_bounds = array<i64: 64, 128>}, {pipeline_mode = #tpu.pipeline_mode<synchronous>, transform_indices = @transform_4, window_bounds = array<i64: 1, 128>}, {pipeline_mode = #tpu.pipeline_mode<synchronous>, transform_indices = @transform_5, window_bounds = array<i64: 64, 128>}, {pipeline_mode = #tpu.pipeline_mode<synchronous>, transform_indices = @transform_6, window_bounds = array<i64: 1, 128>}, {transform_indices = @transform_7, window_bounds = array<i64: 64, 128>}, {transform_indices = @transform_8, window_bounds = array<i64: 1, 128>}, {transform_indices = @transform_9, window_bounds = array<i64: 8, 128>}, {transform_indices = @transform_10, window_bounds = array<i64: 8, 128>}, {transform_indices = @transform_11, window_bounds = array<i64: 8, 128>}]} {
    %c0_i32 = arith.constant 0 : i32
    %0 = arith.cmpi eq, %arg1, %c0_i32 : i32
    %1 = arith.extui %0 : i1 to i32
    %c0_i32_0 = arith.constant 0 : i32
    %2 = arith.cmpi ne, %1, %c0_i32_0 : i32
    scf.if %2 {
      %c0_9 = arith.constant 0 : index
      %c0_10 = arith.constant 0 : index
      %16 = vector.load %arg2[%c0_9, %c0_10] : memref<8x32xf32, #tpu.memory_space<vmem>>, vector<8x32xf32>
      %17 = arith.truncf %16 : vector<8x32xf32> to vector<8x32xbf16>
      %c0_11 = arith.constant 0 : index
      %c0_12 = arith.constant 0 : index
      %18 = vector.load %arg3[%c0_11, %c0_12] : memref<32x192xbf16, #tpu.memory_space<vmem>>, vector<32x192xbf16>
      %cst_13 = arith.constant dense<0.000000e+00> : vector<8x192xf32>
      %19 = tpu.matmul %17, %18, %cst_13 {dimension_numbers = #tpu.dot_dimension_numbers<[1], [0], [0], [1], [0, 0, 1, 1], [], []>} : vector<8x32xbf16>, vector<32x192xbf16>, vector<8x192xf32> -> vector<8x192xf32>
      %c0_14 = arith.constant 0 : index
      %c0_15 = arith.constant 0 : index
      %20 = vector.load %arg4[%c0_14, %c0_15] : memref<1x192xf32, #tpu.memory_space<vmem>>, vector<1x192xf32>
      %21 = vector.broadcast %20 : vector<1x192xf32> to vector<8x192xf32>
      %22 = arith.addf %19, %21 : vector<8x192xf32>
      %cst_16 = arith.constant 0.000000e+00 : f32
      %23 = vector.broadcast %cst_16 : f32 to vector<8x192xf32>
      %24 = arith.maximumf %22, %23 : vector<8x192xf32>
      %25 = arith.truncf %24 : vector<8x192xf32> to vector<8x192xbf16>
      %c0_17 = arith.constant 0 : index
      %c0_18 = arith.constant 0 : index
      %26 = vector.load %arg14[%c0_17, %c0_18] : memref<8x192xbf16, #tpu.memory_space<vmem>>, vector<8x192xbf16>
      tpu.vector_store %arg14[%c0_17, %c0_18], %25 {strides = array<i32>} : memref<8x192xbf16, #tpu.memory_space<vmem>>, vector<8x192xbf16>,
      %27 = vector.extract_strided_slice %25 {offsets = [0, 0], sizes = [8, 64], strides = [1, 1]} : vector<8x192xbf16> to vector<8x64xbf16>
      %c0_19 = arith.constant 0 : index
      %c0_20 = arith.constant 0 : index
      %28 = vector.load %arg5[%c0_19, %c0_20] : memref<64x128xbf16, #tpu.memory_space<vmem>>, vector<64x128xbf16>
      %cst_21 = arith.constant dense<0.000000e+00> : vector<8x128xf32>
      %29 = tpu.matmul %27, %28, %cst_21 {dimension_numbers = #tpu.dot_dimension_numbers<[1], [0], [0], [1], [0, 0, 1, 1], [], []>} : vector<8x64xbf16>, vector<64x128xbf16>, vector<8x128xf32> -> vector<8x128xf32>
      %c0_22 = arith.constant 0 : index
      %c0_23 = arith.constant 0 : index
      %30 = vector.load %arg6[%c0_22, %c0_23] : memref<1x128xf32, #tpu.memory_space<vmem>>, vector<1x128xf32>
      %31 = vector.broadcast %30 : vector<1x128xf32> to vector<8x128xf32>
      %32 = arith.addf %29, %31 : vector<8x128xf32>
      %cst_24 = arith.constant 0.000000e+00 : f32
      %33 = vector.broadcast %cst_24 : f32 to vector<8x128xf32>
      %34 = arith.subf %33, %32 : vector<8x128xf32>
      %35 = math.exp %34 : vector<8x128xf32>
      %cst_25 = arith.constant 1.000000e+00 : f32
      %36 = vector.broadcast %cst_25 : f32 to vector<8x128xf32>
      %37 = arith.addf %36, %35 : vector<8x128xf32>
      %38 = tpu.reciprocal %37 {approx = true} : vector<8x128xf32> -> vector<8x128xf32>
      %c0_26 = arith.constant 0 : index
      %c0_27 = arith.constant 0 : index
      %39 = vector.load %arg11[%c0_26, %c0_27] : memref<8x128xf32, #tpu.memory_space<vmem>>, vector<8x128xf32>
      tpu.vector_store %arg11[%c0_26, %c0_27], %38 {strides = array<i32>} : memref<8x128xf32, #tpu.memory_space<vmem>>, vector<8x128xf32>,
      %40 = vector.extract_strided_slice %25 {offsets = [0, 64], sizes = [8, 64], strides = [1, 1]} : vector<8x192xbf16> to vector<8x64xbf16>
      %c0_28 = arith.constant 0 : index
      %c0_29 = arith.constant 0 : index
      %41 = vector.load %arg7[%c0_28, %c0_29] : memref<64x128xbf16, #tpu.memory_space<vmem>>, vector<64x128xbf16>
      %cst_30 = arith.constant dense<0.000000e+00> : vector<8x128xf32>
      %42 = tpu.matmul %40, %41, %cst_30 {dimension_numbers = #tpu.dot_dimension_numbers<[1], [0], [0], [1], [0, 0, 1, 1], [], []>} : vector<8x64xbf16>, vector<64x128xbf16>, vector<8x128xf32> -> vector<8x128xf32>
      %c0_31 = arith.constant 0 : index
      %c0_32 = arith.constant 0 : index
      %43 = vector.load %arg8[%c0_31, %c0_32] : memref<1x128xf32, #tpu.memory_space<vmem>>, vector<1x128xf32>
      %44 = vector.broadcast %43 : vector<1x128xf32> to vector<8x128xf32>
      %45 = arith.addf %42, %44 : vector<8x128xf32>
      %cst_33 = arith.constant 0.000000e+00 : f32
      %46 = vector.broadcast %cst_33 : f32 to vector<8x128xf32>
      %47 = arith.subf %46, %45 : vector<8x128xf32>
      %48 = math.exp %47 : vector<8x128xf32>
      %cst_34 = arith.constant 1.000000e+00 : f32
      %49 = vector.broadcast %cst_34 : f32 to vector<8x128xf32>
      %50 = arith.addf %49, %48 : vector<8x128xf32>
      %51 = tpu.reciprocal %50 {approx = true} : vector<8x128xf32> -> vector<8x128xf32>
      %c0_35 = arith.constant 0 : index
      %c0_36 = arith.constant 0 : index
      %52 = vector.load %arg12[%c0_35, %c0_36] : memref<8x128xf32, #tpu.memory_space<vmem>>, vector<8x128xf32>
      tpu.vector_store %arg12[%c0_35, %c0_36], %51 {strides = array<i32>} : memref<8x128xf32, #tpu.memory_space<vmem>>, vector<8x128xf32>,
    } else {
    }
    %c0 = arith.constant 0 : index
    %c128 = arith.constant 128 : index
    %3 = vector.load %arg14[%c0, %c128] : memref<8x192xbf16, #tpu.memory_space<vmem>>, vector<8x64xbf16>
    %c0_1 = arith.constant 0 : index
    %c0_2 = arith.constant 0 : index
    %4 = vector.load %arg9[%c0_1, %c0_2] : memref<64x128xbf16, #tpu.memory_space<vmem>>, vector<64x128xbf16>
    %cst = arith.constant dense<0.000000e+00> : vector<8x128xf32>
    %5 = tpu.matmul %3, %4, %cst {dimension_numbers = #tpu.dot_dimension_numbers<[1], [0], [0], [1], [0, 0, 1, 1], [], []>} : vector<8x64xbf16>, vector<64x128xbf16>, vector<8x128xf32> -> vector<8x128xf32>
    %c0_3 = arith.constant 0 : index
    %c0_4 = arith.constant 0 : index
    %6 = vector.load %arg10[%c0_3, %c0_4] : memref<1x128xf32, #tpu.memory_space<vmem>>, vector<1x128xf32>
    %7 = vector.broadcast %6 : vector<1x128xf32> to vector<8x128xf32>
    %8 = arith.addf %5, %7 : vector<8x128xf32>
    %cst_5 = arith.constant 0.000000e+00 : f32
    %9 = vector.broadcast %cst_5 : f32 to vector<8x128xf32>
    %10 = arith.subf %9, %8 : vector<8x128xf32>
    %11 = math.exp %10 : vector<8x128xf32>
    %cst_6 = arith.constant 1.000000e+00 : f32
    %12 = vector.broadcast %cst_6 : f32 to vector<8x128xf32>
    %13 = arith.addf %12, %11 : vector<8x128xf32>
    %14 = tpu.reciprocal %13 {approx = true} : vector<8x128xf32> -> vector<8x128xf32>
    %c0_7 = arith.constant 0 : index
    %c0_8 = arith.constant 0 : index
    %15 = vector.load %arg13[%c0_7, %c0_8] : memref<8x128xf32, #tpu.memory_space<vmem>>, vector<8x128xf32>
    tpu.vector_store %arg13[%c0_7, %c0_8], %14 {strides = array<i32>} : memref<8x128xf32, #tpu.memory_space<vmem>>, vector<8x128xf32>,
    return
  }
  func.func @transform_0(%arg0: i32, %arg1: i32) -> (i32, i32) {
    %c0_i32 = arith.constant 0 : i32
    %c0_i32_0 = arith.constant 0 : i32
    return %arg0, %c0_i32 : i32, i32
  }
  func.func @transform_1(%arg0: i32, %arg1: i32) -> (i32, i32) {
    %c0_i32 = arith.constant 0 : i32
    %c0_i32_0 = arith.constant 0 : i32
    %c0_i32_1 = arith.constant 0 : i32
    return %c0_i32, %c0_i32_0 : i32, i32
  }
  func.func @transform_2(%arg0: i32, %arg1: i32) -> (i32, i32) {
    %c0_i32 = arith.constant 0 : i32
    %c0_i32_0 = arith.constant 0 : i32
    %c0_i32_1 = arith.constant 0 : i32
    return %c0_i32, %c0_i32_0 : i32, i32
  }
  func.func @transform_3(%arg0: i32, %arg1: i32) -> (i32, i32) {
    %c0_i32 = arith.constant 0 : i32
    %c0_i32_0 = arith.constant 0 : i32
    %c0_i32_1 = arith.constant 0 : i32
    return %c0_i32, %c0_i32_0 : i32, i32
  }
  func.func @transform_4(%arg0: i32, %arg1: i32) -> (i32, i32) {
    %c0_i32 = arith.constant 0 : i32
    %c0_i32_0 = arith.constant 0 : i32
    %c0_i32_1 = arith.constant 0 : i32
    return %c0_i32, %c0_i32_0 : i32, i32
  }
  func.func @transform_5(%arg0: i32, %arg1: i32) -> (i32, i32) {
    %c0_i32 = arith.constant 0 : i32
    %c0_i32_0 = arith.constant 0 : i32
    %c0_i32_1 = arith.constant 0 : i32
    return %c0_i32, %c0_i32_0 : i32, i32
  }
  func.func @transform_6(%arg0: i32, %arg1: i32) -> (i32, i32) {
    %c0_i32 = arith.constant 0 : i32
    %c0_i32_0 = arith.constant 0 : i32
    %c0_i32_1 = arith.constant 0 : i32
    return %c0_i32, %c0_i32_0 : i32, i32
  }
  func.func @transform_7(%arg0: i32, %arg1: i32) -> (i32, i32) {
    %c0_i32 = arith.constant 0 : i32
    %c0_i32_0 = arith.constant 0 : i32
    return %c0_i32, %arg1 : i32, i32
  }
  func.func @transform_8(%arg0: i32, %arg1: i32) -> (i32, i32) {
    %c0_i32 = arith.constant 0 : i32
    %c0_i32_0 = arith.constant 0 : i32
    return %c0_i32, %arg1 : i32, i32
  }
  func.func @transform_9(%arg0: i32, %arg1: i32) -> (i32, i32) {
    %c0_i32 = arith.constant 0 : i32
    %c0_i32_0 = arith.constant 0 : i32
    return %arg0, %c0_i32 : i32, i32
  }
  func.func @transform_10(%arg0: i32, %arg1: i32) -> (i32, i32) {
    %c0_i32 = arith.constant 0 : i32
    %c0_i32_0 = arith.constant 0 : i32
    return %arg0, %c0_i32 : i32, i32
  }
  func.func @transform_11(%arg0: i32, %arg1: i32) -> (i32, i32) {
    %c0_i32 = arith.constant 0 : i32
    return %arg0, %arg1 : i32, i32
  }
}

</mosaic_0001>

<bundles_post_ra>
// kernel: a_call__.1
= control target key start
LH: loop header
LB: loop body
LE: loop exit
PB: predicated region body
PF: predicated region fallthrough
CT: control target
= control target key end

     0   :  { %17 = vsyncpa [#allocation4], 0  ;;  %s965_s0 = inlined_call_operand.hbm [shape: f32[8,32], index: 0, kind: input, shape index: {}]   ;;  %s966_s1 = inlined_call_operand.vmem [shape: bf16[32,192], index: 1, kind: input, shape index: {}]   ;;  %s967_s2 = inlined_call_operand.vmem [shape: f32[1,192], index: 2, kind: input, shape index: {}]   ;;  %s968_s3 = inlined_call_operand.vmem [shape: bf16[64,128], index: 3, kind: input, shape index: {}]   ;;  %s969_s4 = inlined_call_operand.hbm [shape: f32[1,128], index: 4, kind: input, shape index: {}]   ;;  %s970_s5 = inlined_call_operand.vmem [shape: bf16[64,128], index: 5, kind: input, shape index: {}]   ;;  %s971_s6 = inlined_call_operand.hbm [shape: f32[1,128], index: 6, kind: input, shape index: {}]   ;;  %s972_s7 = inlined_call_operand.vmem [shape: bf16[64,128], index: 7, kind: input, shape index: {}]   ;;  %s973_s8 = inlined_call_operand.hbm [shape: f32[1,128], index: 8, kind: input, shape index: {}]   ;;  %s974_s9 = inlined_call_operand.vmem [shape: f32[8,128], index: 9, kind: output, shape index: {0}]   ;;  %s975_s10 = inlined_call_operand.hbm [shape: f32[8,128], index: 10, kind: output, shape index: {1}]   ;;  %s976_s11 = inlined_call_operand.hbm [shape: f32[8,128], index: 11, kind: output, shape index: {2}]  }
   0x1   :  { %18 = vsyncpa [#allocation7], 0 }
   0x2   :  { %19 = vsyncpa [#allocation10], 0 }
   0x3   :  { %20 = vsyncpa [#allocation5], 0 }
   0x4   :  { %21 = vsyncpa [#allocation13], 0  ;;  %s748_s17 = smov [#allocation6]   ;;  %s749_s19 = smov [#allocation3]  }
   0x5   :  { %s44_s18 = sshll.u32 %s748_s17, 4  ;;  %s28_s20 = sshll.u32 %s749_s19, 4  ;;  %s45_s18 = int_to_ptr.vmem [resolvable:$true] %s44_s18  ;;  %s29_s20 = int_to_ptr.vmem [resolvable:$true] %s28_s20 }
   0x6   :  { %s606_s23 = scalar_lea.hbm %s969_s4, 16 }
   0x7   :  { %p607_p0 = scmp.ne.s32.totalorder %s969_s4, %s606_s23  ;;  %p610_p1 = scmp.lt.u32.totalorder %s606_s23, %s969_s4 }
   0x9   :  { %p612_p2 = pnand %p610_p1, %p607_p0 }
   0xb   :  { %615 = shalt.err (!%p612_p2)
}
   0xc   :  { %s616_s28 = scalar_lea.vmem %s45_s18, 16  ;;  %s620_s29 = scalar_lea.vmem %s45_s18, 32 }
   0xd   :  { %p617_p3 = scmp.ne.s32.totalorder %s45_s18, %s616_s28  ;;  %p621_p4 = scmp.lt.s32.totalorder %s45_s18, %s45_s18 }
   0xe   :  { %p622_p5 = scmp.lt.s32.totalorder %s620_s29, %s616_s28 }
  0x10   :  { %p623_p6 = por %p622_p5, %p621_p4 }
  0x12   :  { %p624_p7 = pnand %p623_p6, %p617_p3 }
  0x14   :  { %627 = shalt.err (!%p624_p7)
}
  0x15   :  { %47 = dma.hbm_to_vmem [thread:$0]  %s969_s4, 16, %s45_s18, [#allocation7]  }
  0x16   :  { %s628_s15 = scalar_lea.hbm %s965_s0, 128 }
  0x17   :  { %p629_p8 = scmp.ne.s32.totalorder %s965_s0, %s628_s15  ;;  %p632_p9 = scmp.lt.u32.totalorder %s628_s15, %s965_s0 }
  0x19   :  { %p634_p10 = pnand %p632_p9, %p629_p8 }
  0x1b   :  { %637 = shalt.err (!%p634_p10)
}
  0x1c   :  { %s638_s22 = scalar_lea.vmem %s29_s20, 128  ;;  %p643_p12 = scmp.lt.s32.totalorder %s29_s20, %s29_s20 }
  0x1d   :  { %p639_p11 = scmp.ne.s32.totalorder %s29_s20, %s638_s22  ;;  %p644_p13 = scmp.lt.s32.totalorder %s638_s22, %s638_s22 }
  0x1f   :  { %p645_p0 = por %p644_p13, %p643_p12 }
  0x21   :  { %p646_p1 = pnand %p645_p0, %p639_p11 }
  0x23   :  { %649 = shalt.err (!%p646_p1)
}
  0x24   :  { %31 = dma.hbm_to_vmem [thread:$0]  %s965_s0, 128, %s29_s20, [#allocation4]  }
  0x25   :  { %s750_s23 = smov [#allocation8]   ;;  %s751_s25 = smov [#allocation9]  }
  0x26   :  { %s56_s24 = sshll.u32 %s750_s23, 4  ;;  %s68_s26 = sshll.u32 %s751_s25, 4  ;;  %s57_s24 = int_to_ptr.vmem [resolvable:$true] %s56_s24  ;;  %s69_s26 = int_to_ptr.vmem [resolvable:$true] %s68_s26 }
  0x27   :  { %s650_s29 = scalar_lea.hbm %s971_s6, 16 }
  0x28   :  { %p651_p2 = scmp.ne.s32.totalorder %s971_s6, %s650_s29  ;;  %p654_p3 = scmp.lt.u32.totalorder %s650_s29, %s971_s6 }
  0x2a   :  { %p656_p4 = pnand %p654_p3, %p651_p2 }
  0x2c   :  { %659 = shalt.err (!%p656_p4)
}
  0x2d   :  { %s660_s0 = scalar_lea.vmem %s57_s24, 16  ;;  %s664_s20 = scalar_lea.vmem %s57_s24, 32 }
  0x2e   :  { %p661_p5 = scmp.ne.s32.totalorder %s57_s24, %s660_s0  ;;  %p665_p6 = scmp.lt.s32.totalorder %s57_s24, %s57_s24 }
  0x2f   :  { %p666_p7 = scmp.lt.s32.totalorder %s664_s20, %s660_s0 }
  0x31   :  { %p667_p8 = por %p666_p7, %p665_p6 }
  0x33   :  { %p668_p9 = pnand %p667_p8, %p661_p5 }
  0x35   :  { %671 = shalt.err (!%p668_p9)
}
  0x36   :  { %59 = dma.hbm_to_vmem [thread:$0]  %s971_s6, 16, %s57_s24, [#allocation7]  }
  0x37   :  { %s672_s21 = scalar_lea.hbm %s973_s8, 16 }
  0x38   :  { %p673_p10 = scmp.ne.s32.totalorder %s973_s8, %s672_s21  ;;  %p676_p11 = scmp.lt.u32.totalorder %s672_s21, %s973_s8 }
  0x3a   :  { %p678_p12 = pnand %p676_p11, %p673_p10 }
  0x3c   :  { %681 = shalt.err (!%p678_p12)
}
  0x3d   :  { %s682_s25 = scalar_lea.vmem %s69_s26, 16  ;;  %s686_s27 = scalar_lea.vmem %s69_s26, 32 }
  0x3e   :  { %p683_p13 = scmp.ne.s32.totalorder %s69_s26, %s682_s25  ;;  %p687_p0 = scmp.lt.s32.totalorder %s69_s26, %s69_s26 }
  0x3f   :  { %p688_p1 = scmp.lt.s32.totalorder %s686_s27, %s682_s25 }
  0x41   :  { %p689_p2 = por %p688_p1, %p687_p0 }
  0x43   :  { %p690_p3 = pnand %p689_p2, %p683_p13 }
  0x45   :  { %693 = shalt.err (!%p690_p3)
}
  0x46   :  { %71 = dma.hbm_to_vmem [thread:$0]  %s973_s8, 16, %s69_s26, [#allocation10]  }
  0x47   :  { %738 = dma.done.wait [#allocation4], 128  }
  0x48   :  { %739 = vsyncadd [#allocation4], 4294967168 }
  0x49   :  { %740 = dma.done.wait [#allocation7], 32  }
  0x4a   :  { %741 = vsyncadd [#allocation7], 4294967264 }
  0x4b   :  { %742 = dma.done.wait [#allocation10], 16  }
  0x4c   :  { %743 = vsyncadd [#allocation10], 4294967280  ;;  %v752_v0 = vmov 0   ;;  %v753_v1 = vmov 0.0   ;;  %v576_v2 = vld [vmem:[%s966_s1 + $0x4] ss:$8 sps:$4 sm:$0xff]   ;;  %v97_v16 = vlaneseq }
  0x4d   :  { %163 = vmatprep.mubr.bf16.mxu0 %v752_v0  ;;  %530 = vmatprep.subr.bf16.mxu1 %v753_v1  ;;  %v578_v3 = vld [vmem:[%s966_s1] ss:$8 sps:$4 sm:$0xff]   ;;  %v579_v4 = vld [vmem:[%s966_s1 + $0x14] ss:$8 sps:$4 sm:$0xff]   ;;  %v581_v5 = vld [vmem:[%s966_s1 + $0x10] ss:$8 sps:$4 sm:$0xff]  }
  0x4e   :  { %131 = vmatprep.subr.bf16.mxu0 %v576_v2  ;;  %v89_v6 = vld [vmem:[#allocation3] sm:$0xff]  ;;  %v582_v7 = vld [vmem:[%s968_s3] sm:$0xff]   ;;  %vm127_vm0 = vcmask 261120   ;;  %v584_v10 = vld [vmem:[%s968_s3 + $0x10] sm:$0xff]   ;;  %vm754_vm1 = vmmov 0   ;;  %v98_v17 = vshrl.u32 %v97_v16, 7 }
  0x4f   :  { %132 = vmatpush1.bf16.msra.mxu0 %v578_v3  ;;  %531 = vmatpush3.bf16.msra.mxu1 %v582_v7  ;;  %v583_v8 = vld [vmem:[%s968_s3 + $0x8] sm:$0xff]   ;;  %v90_v9 = vpack.c.bf16 %v89_v6, %v89_v6  ;;  %v585_v11 = vld [vmem:[%s968_s3 + $0x18] sm:$0xff]   ;;  %v590_v12 = vld [vmem:[%s970_s5] sm:$0xff]   ;;  %vm182_vm2 = vcmask 1043456   ;;  %vm183_vm3 = vcmask 523268   ;;  %vm225_vm4 = vcmask 523264  }
  0x50   :  { %133 = vmatprep.subr.bf16.mxu0 %v579_v4  ;;  %532 = vmatprep.subr.bf16.mxu1 %v753_v1  ;;  %v591_v13 = vld [vmem:[%s970_s5 + $0x8] sm:$0xff]   ;;  %v592_v14 = vld [vmem:[%s970_s5 + $0x10] sm:$0xff]   ;;  %v593_v15 = vld [vmem:[%s970_s5 + $0x18] sm:$0xff]   ;;  %v99_v18 = vsub.s32 0, %v98_v17  ;;  %v103_v20 = vsub.s32 1, %v98_v17  ;;  %s756_s20 = smov [#allocation12]  }
  0x51   :  { %538 = vmatprep.mubr.msk.bf16.mxu1 %vm754_vm1, %v753_v1  ;;  %v95_v19 = vld [vmem:[%s967_s2] sm:$0x3]  ;;  %vm184_vm5 = vmor %vm183_vm3, %vm182_vm2  ;;  %s755_s2 = smov 64   ;;  %v587_v34 = vld [vmem:[%s972_s7 + $0x8] sm:$0xff]   ;;  %s473_s15 = sshll.u32 %s756_s20, 4  ;;  %s474_s15 = int_to_ptr.vmem [resolvable:$true] %s473_s15 }
  0x52   :  { %v100_v21 = vrot.slane %v95_v19, %v99_v18  ;;  %v104_v22 = vrot.slane %v95_v19, %v103_v20  ;;  %v586_v31 = vld [vmem:[%s972_s7] sm:$0xff]   ;;  %v588_v35 = vld [vmem:[%s972_s7 + $0x10] sm:$0xff]   ;;  %v589_v36 = vld [vmem:[%s972_s7 + $0x18] sm:$0xff]   ;;  %s694_s16 = scalar_lea.vmem %s474_s15, 128  ;;  %p699_p5 = scmp.lt.s32.totalorder %s474_s15, %s474_s15 }
  0x53   :  { %134 = vmatpush1.bf16.msra.mxu0 %v581_v5  ;;  %533 = vmatpush3.bf16.msra.mxu1 %v583_v8  ;;  %v496_v39 = vld [vmem:[#allocation6] ss:$0 sm:$0xff]  ;;  %v508_v47 = vld [vmem:[#allocation9] ss:$0 sm:$0xff]  ;;  %p695_p4 = scmp.ne.s32.totalorder %s474_s15, %s694_s16  ;;  %p700_p6 = scmp.lt.s32.totalorder %s694_s16, %s694_s16 }
  0x54   :  { %542 = vmatprep.subr.bf16.mxu0 %v753_v1  ;;  %534 = vmatprep.subr.bf16.mxu1 %v753_v1 }
  0x55   :  { %p701_p7 = por %p700_p6, %p699_p5 }
  0x56   :  { %494 = vmatmul.mubr.msk.bf16.vlgmr.msra.gmra.mrb[0].mxu0 %vm127_vm0, %v90_v9 }
  0x57   :  { %535 = vmatpush3.bf16.msra.mxu1 %v584_v10  ;;  %550 = vmatprep.mubr.msk.bf16.mxu0 %vm754_vm1, %v753_v1  ;;  %p702_p8 = pnand %p701_p7, %p695_p4 }
  0x58   :  { %536 = vmatprep.subr.bf16.mxu1 %v753_v1  ;;  %543 = vmatpush3.bf16.msra.mxu0 %v590_v12 }
  0x59   :  { %544 = vmatprep.subr.bf16.mxu0 %v753_v1 }
  0x5b   :  { %537 = vmatpush3.bf16.msra.mxu1 %v585_v11 }
  0x5c   :  { %554 = vmatprep.subr.bf16.mxu1 %v753_v1  ;;  %545 = vmatpush3.bf16.msra.mxu0 %v591_v13 }
  0x5d   :  { %546 = vmatprep.subr.bf16.mxu0 %v753_v1 }
  0x60   :  { %547 = vmatpush3.bf16.msra.mxu0 %v592_v14 }
  0x61   :  { %548 = vmatprep.subr.bf16.mxu0 %v753_v1 }
  0x64   :  { %549 = vmatpush3.bf16.msra.mxu0 %v593_v15 }
 0x129   :  { %v165_v23 = vpop.f32.mrb[0].mxu0 }
 0x12a   :  { %v166_v24 = vadd.f32 %v165_v23, %v100_v21  ;;  %v167_v25 = vpop.f32.mrb[1].mxu0 }
 0x12b   :  { %v168_v26 = vadd.f32 %v167_v25, %v104_v22  ;;  %v169_v27 = vpop.f32.mrb[2].mxu0 }
 0x12c   :  { %v172_v28 = vmax.f32 %v166_v24, 0.0  ;;  %v170_v29 = vpop.f32.mrb[3].mxu0 }
 0x12d   :  { %v173_v30 = vmax.f32 %v168_v26, 0.0 }
 0x12e   :  { %v174_v32 = vpack.c.bf16 %v172_v28, %v172_v28 }
 0x12f   :  { %v514_v33 = vpack.c.bf16 %v173_v30, %v172_v28 }
 0x130   :  { %539 = vmatmul.mubr.msk.bf16.vlgmr.msra.gmra.mrb[0].mxu1 %vm225_vm4, %v174_v32  ;;  %290 = vrot.lane.b32.xlu0 %v174_v32, %s755_s2 }
 0x131   :  { %185 = vst.msk [vmem:[#allocation2] sm:$0xff] %vm184_vm5, %v514_v33  ;;  %555 = vmatpush3.bf16.msra.mxu1 %v586_v31  ;;  %562 = vmatprep.mubr.msk.bf16.mxu1 %vm754_vm1, %v753_v1 }
 0x132   :  { %556 = vmatprep.subr.bf16.mxu1 %v753_v1 }
 0x135   :  { %557 = vmatpush3.bf16.msra.mxu1 %v587_v34 }
 0x136   :  { %558 = vmatprep.subr.bf16.mxu1 %v753_v1 }
 0x138   :  { %v365_v37 = vld [vmem:[#allocation2 + $0x4] sm:$0xf] }
 0x139   :  { %559 = vmatpush3.bf16.msra.mxu1 %v588_v35 }
 0x13a   :  { %560 = vmatprep.subr.bf16.mxu1 %v753_v1 }
 0x13d   :  { %561 = vmatpush3.bf16.msra.mxu1 %v589_v36 }
 0x140   :  { %563 = vmatmul.mubr.msk.bf16.vlgmr.msra.gmra.mrb[4].mxu1 %vm225_vm4, %v365_v37 }
 0x1a2   :  { %v291_v38 = vpop.permute.xlu0 %290 }
 0x1a3   :  { %551 = vmatmul.mubr.msk.bf16.vlgmr.msra.gmra.mrb[4].mxu0 %vm225_vm4, %v291_v38 }
 0x203   :  { %v263_v40 = vpop.f32.mrb[0].mxu1 }
 0x204   :  { %v264_v41 = vadd.f32 %v496_v39, %v263_v40  ;;  %v540_v42 = vpop.f32.mrb[1].mxu1 }
 0x205   :  { %v266_v43 = vpop.f32.mrb[2].mxu1 }
 0x206   :  { %v269_v44 = vsub.f32 0.0, %v264_v41  ;;  %v541_v45 = vpop.f32.mrb[3].mxu1 }
 0x208   :  { %v270_v46 = vmul.f32 1.442695, %v269_v44 }
 0x20a   :  { %594 = vpow2.f32 %v270_v46 }
 0x213   :  { %v443_v48 = vpop.f32.mrb[4].mxu1 }
 0x214   :  { %v595_v49 = vpop.eup %594  ;;  %v444_v50 = vadd.f32 %v508_v47, %v443_v48  ;;  %v564_v51 = vpop.f32.mrb[5].mxu1 }
 0x215   :  { %v272_v52 = vadd.f32 1.0, %v595_v49  ;;  %v446_v53 = vpop.f32.mrb[6].mxu1 }
 0x216   :  { %v449_v54 = vsub.f32 0.0, %v444_v50  ;;  %v565_v55 = vpop.f32.mrb[7].mxu1 }
 0x217   :  { %596 = vrcp.f32 %v272_v52 }
 0x218   :  { %v450_v56 = vmul.f32 1.442695, %v449_v54 }
 0x21a   :  { %598 = vpow2.f32 %v450_v56 }
 0x221   :  { %v597_v57 = vpop.eup %596 }
 0x222   :  { %274 = vst [vmem:[%s974_s9] sm:$0xff] %v597_v57 }
 0x224   :  { %v599_v58 = vpop.eup %598 }
 0x225   :  { %v452_v59 = vadd.f32 1.0, %v599_v58 }
 0x227   :  { %600 = vrcp.f32 %v452_v59 }
 0x231   :  { %v601_v60 = vpop.eup %600 }
 0x232   :  { %454 = vst [vmem:[#allocation12] sm:$0xff] %v601_v60 }
 0x233   :  { %705 = shalt.err (!%p702_p8)
}
 0x234   :  { %s706_s1 = scalar_lea.hbm %s976_s11, 128 }
 0x235   :  { %p707_p9 = scmp.ne.s32.totalorder %s976_s11, %s706_s1  ;;  %p710_p10 = scmp.lt.u32.totalorder %s706_s1, %s976_s11 }
 0x237   :  { %p712_p11 = pnand %p710_p10, %p707_p9 }
 0x239   :  { %715 = shalt.err (!%p712_p11)
}
 0x23a   :  { %476 = dma.vmem_to_hbm [thread:$0]  %s474_s15, 128, %s976_s11, [#allocation13]   ;;  %v502_v61 = vld [vmem:[#allocation8] ss:$0 sm:$0xff] }
 0x23b   :  { %s757_s3 = smov [#allocation11]  }
 0x23c   :  { %s463_s25 = sshll.u32 %s757_s3, 4  ;;  %s464_s25 = int_to_ptr.vmem [resolvable:$true] %s463_s25 }
 0x23d   :  { %s716_s27 = scalar_lea.vmem %s464_s25, 128  ;;  %p721_p13 = scmp.lt.s32.totalorder %s464_s25, %s464_s25 }
 0x23e   :  { %p717_p12 = scmp.ne.s32.totalorder %s464_s25, %s716_s27  ;;  %p722_p0 = scmp.lt.s32.totalorder %s716_s27, %s716_s27 }
 0x240   :  { %p723_p1 = por %p722_p0, %p721_p13 }
 0x242   :  { %p724_p2 = pnand %p723_p1, %p717_p12 }
 0x276   :  { %v353_v62 = vpop.f32.mrb[4].mxu0 }
 0x277   :  { %v354_v63 = vadd.f32 %v502_v61, %v353_v62  ;;  %v552_v0 = vpop.f32.mrb[5].mxu0 }
 0x278   :  { %v356_v1 = vpop.f32.mrb[6].mxu0 }
 0x279   :  { %v359_v2 = vsub.f32 0.0, %v354_v63  ;;  %v553_v3 = vpop.f32.mrb[7].mxu0 }
 0x27b   :  { %v360_v4 = vmul.f32 1.442695, %v359_v2 }
 0x27d   :  { %602 = vpow2.f32 %v360_v4 }
 0x287   :  { %v603_v5 = vpop.eup %602 }
 0x288   :  { %v362_v6 = vadd.f32 1.0, %v603_v5 }
 0x28a   :  { %604 = vrcp.f32 %v362_v6 }
 0x294   :  { %v605_v7 = vpop.eup %604 }
 0x295   :  { %364 = vst [vmem:[#allocation11] sm:$0xff] %v605_v7 }
 0x296   :  { %727 = shalt.err (!%p724_p2)
}
 0x297   :  { %s728_s24 = scalar_lea.hbm %s975_s10, 128 }
 0x298   :  { %p729_p3 = scmp.ne.s32.totalorder %s975_s10, %s728_s24  ;;  %p732_p4 = scmp.lt.u32.totalorder %s728_s24, %s975_s10 }
 0x29a   :  { %p734_p5 = pnand %p732_p4, %p729_p3 }
 0x29c   :  { %737 = shalt.err (!%p734_p5)
}
 0x29d   :  { %466 = dma.vmem_to_hbm [thread:$0]  %s464_s25, 128, %s975_s10, [#allocation5]  }
 0x29e   :  { %744 = dma.done.wait [#allocation5], 128  }
 0x29f   :  { %745 = vsyncadd [#allocation5], 4294967168 }
 0x2a0   :  { %746 = dma.done.wait [#allocation13], 128  }
 0x2a1   :  { %747 = vsyncadd [#allocation13], 4294967168 }
 0x2a2   :  { %485 = vsyncpa [#allocation4], 1 }
 0x2a3   :  { %486 = vsyncpa [#allocation7], 1 }
 0x2a4   :  { %487 = vsyncpa [#allocation10], 1 }
 0x2a5   :  { %488 = vsyncpa [#allocation5], 1 }
 0x2a6   :  { %489 = vsyncpa [#allocation13], 1 }

</bundles_post_ra>
